<compile_context>
chip_gen: v6e
topology: v6e:2x2x1
jax: 0.10.0
libtpu: 0.0.40
codegen_flags: <defaults>
</compile_context>

<pallas_src>
import functools

import jax
import jax.numpy as jnp
from jax.experimental import pallas as pl
from jax.experimental.pallas import tpu as pltpu

_LANE = 128      # vreg lane width


def _round_up(n, m):
    return ((n + m - 1) // m) * m


def actor_kernel(x_ref, w1_ref, b1_ref, w2_ref, b2_ref, w3_ref, b3_ref,
                 out_ref, *, action_bound):
    wdt = w1_ref.dtype  # MXU operand dtype (bf16 on the fast path, f32 debug)
    # fc1 + relu: MXU matmul, f32 accumulation, f32 epilogue on the VPU.
    h1 = jnp.dot(x_ref[...], w1_ref[...], preferred_element_type=jnp.float32)
    h1 = jnp.maximum(h1 + b1_ref[...], 0.0)
    # fc2 + relu: cast activations back to the operand dtype for the MXU only.
    h2 = jnp.dot(h1.astype(wdt), w2_ref[...], preferred_element_type=jnp.float32)
    h2 = jnp.maximum(h2 + b2_ref[...], 0.0)
    # fc3 + tanh (f32 on the EUP), scaled by the static action_bound.
    h3 = jnp.dot(h2.astype(wdt), w3_ref[...], preferred_element_type=jnp.float32)
    h3 = jnp.tanh(h3 + b3_ref[...])
    out_ref[...] = (h3 * action_bound).astype(out_ref.dtype)


def pad_actor_params(params, compute_dtype=jnp.bfloat16):
    """Zero-pad the hidden dim to a multiple of 128 lanes (exact: relu(0)=0 and
    zero weight rows/cols contribute nothing) and cast weights to the MXU
    operand dtype.  Biases stay f32 (epilogue runs in f32).  Weights are
    stored [in_features, out_features]; biases become [1, out]."""
    hidden = params["w1"].shape[1]
    hp = _round_up(hidden, _LANE)
    dh = hp - hidden
    w1 = jnp.pad(params["w1"], ((0, 0), (0, dh))).astype(compute_dtype)
    b1 = jnp.pad(params["b1"], ((0, dh),)).reshape(1, hp).astype(jnp.float32)
    w2 = jnp.pad(params["w2"], ((0, dh), (0, dh))).astype(compute_dtype)
    b2 = jnp.pad(params["b2"], ((0, dh),)).reshape(1, hp).astype(jnp.float32)
    w3 = jnp.pad(params["w3"], ((0, dh), (0, 0))).astype(compute_dtype)
    b3 = params["b3"].reshape(1, -1).astype(jnp.float32)
    return w1, b1, w2, b2, w3, b3


def _choose_tiling(batch, tm_max, sublane):
    """Pick (tm, n_steps, padded_batch) so that
       * each tile is <= tm_max rows,
       * there are >= 2 grid steps whenever the batch allows a full sublane
         group per step (so the "parallel" batch axis can be sharded across
         both TensorCores on v7x; extra ~0.35us steps are harmless on 1-TC
         v5e/v6e),
       * batch padding is at most ~one sublane group per step (no round-up of
         the whole batch to a multiple of tm_max)."""
    min_steps = 2 if batch >= 2 * sublane else 1
    n_steps = max(pl.cdiv(batch, tm_max), min_steps)
    tm = _round_up(pl.cdiv(batch, n_steps), sublane)
    padded_batch = tm * n_steps
    return tm, n_steps, padded_batch


def actor_forward(x, params, action_bound, *, tm_max=1024,
                  compute_dtype=jnp.bfloat16):
    """x: [batch, n_states] f32. params: w1,b1,w2,b2,w3,b3 with weights [in, out]."""
    batch, n_states = x.shape
    n_actions = params["w3"].shape[1]

    w1, b1, w2, b2, w3, b3 = pad_actor_params(params, compute_dtype)
    hp = w1.shape[1]  # padded hidden width (multiple of 128)

    # bf16 packs [16, 128] per vreg -> batch tile must be a multiple of 16.
    sublane = 16 if jnp.dtype(compute_dtype).itemsize == 2 else 8
    tm, n_steps, padded_batch = _choose_tiling(batch, tm_max, sublane)

    # Cast the streamed operand in the wrapper so its per-tile DMA is already
    # in the MXU operand dtype (halves x HBM traffic for bf16).
    x = x.astype(compute_dtype)
    if padded_batch != batch:
        x = jnp.pad(x, ((0, padded_batch - batch), (0, 0)))

    kernel = functools.partial(actor_kernel, action_bound=float(action_bound))

    weight_bytes = sum(a.size * a.dtype.itemsize
                       for a in (w1, b1, w2, b2, w3, b3))
    cost = pl.CostEstimate(
        flops=2 * padded_batch * (n_states * hp + hp * hp + hp * n_actions),
        # Advisory only: actual EUP work is full 128-lane vregs.
        transcendentals=padded_batch * n_actions,
        bytes_accessed=(x.size * x.dtype.itemsize
                        + padded_batch * n_actions * 4
                        + weight_bytes),
    )

    def call(resident_pipeline_mode):
        def resident(a):
            # Constant block index -> VMEM-resident, DMA'd exactly once.
            kwargs = {}
            if resident_pipeline_mode is not None:
                kwargs["pipeline_mode"] = resident_pipeline_mode
            return pl.BlockSpec(a.shape, lambda i: (0, 0), **kwargs)

        in_specs = [
            pl.BlockSpec((tm, n_states), lambda i: (i, 0)),   # x streamed over batch
            resident(w1), resident(b1),
            resident(w2), resident(b2),
            resident(w3), resident(b3),
        ]
        out_spec = pl.BlockSpec((tm, n_actions), lambda i: (i, 0))

        return pl.pallas_call(
            kernel,
            out_shape=jax.ShapeDtypeStruct((padded_batch, n_actions), jnp.float32),
            grid=(n_steps,),
            in_specs=in_specs,
            out_specs=out_spec,
            compiler_params=pltpu.CompilerParams(
                dimension_semantics=("parallel",)),
            cost_estimate=cost,
        )(x, w1, b1, w2, b2, w3, b3)

    try:
        # Weights/biases are never re-fetched; single-buffer them to skip the
        # useless second pipeline buffer.
        out = call(pl.Buffered(buffer_count=1))
    except Exception:
        # Fallback if single-buffered pipeline_mode is unsupported on this
        # jax version: plain double-buffered resident specs (still correct).
        out = call(None)

    return out[:batch]


def init_actor_params(key, n_states, hidden, n_actions):
    """Deterministic synthetic init. Weights stored as [in, out]."""
    ks = jax.random.split(key, 6)

    def lin(kw, kb, fan_in, fan_out):
        # mimic PyTorch Linear default: U(-1/sqrt(fan_in), 1/sqrt(fan_in))
        lim = 1.0 / jnp.sqrt(fan_in)
        w = jax.random.uniform(kw, (fan_in, fan_out), jnp.float32, -lim, lim)
        b = jax.random.uniform(kb, (fan_out,), jnp.float32, -lim, lim)
        return w, b

    w1, b1 = lin(ks[0], ks[1], n_states, hidden)
    w2, b2 = lin(ks[2], ks[3], hidden, hidden)
    w3, b3 = lin(ks[4], ks[5], hidden, n_actions)
    return {"w1": w1, "b1": b1, "w2": w2, "b2": b2, "w3": w3, "b3": b3}


if __name__ == "__main__":
    # cfg: n_states=8, actor_hidden_dim=32, n_actions=4, action_bound=2.0
    n_states, hidden, n_actions = 8, 32, 4
    batch = 8
    action_bound = 2.0

    key = jax.random.PRNGKey(0)
    kx, kp = jax.random.split(key)
    x = jax.random.normal(kx, (batch, n_states), jnp.float32)
    params = init_actor_params(kp, n_states, hidden, n_actions)

    # pure-JAX f32 reference (unpadded params)
    h1 = jnp.maximum(x @ params["w1"] + params["b1"], 0.0)
    h2 = jnp.maximum(h1 @ params["w2"] + params["b2"], 0.0)
    ref = jnp.tanh(h2 @ params["w3"] + params["b3"]) * action_bound

    # Fast path: bf16 MXU operands, f32 accumulation/epilogue.
    out_bf16 = jax.block_until_ready(actor_forward(x, params, action_bound))
    assert out_bf16.shape == (batch, n_actions)
    assert jnp.allclose(out_bf16, ref, atol=5e-2, rtol=5e-2)

    # f32 debug path keeps the original strict correctness check.
    out_f32 = jax.block_until_ready(
        actor_forward(x, params, action_bound, compute_dtype=jnp.float32))
    assert out_f32.shape == (batch, n_actions)
    assert jnp.allclose(out_f32, ref, atol=1e-5, rtol=1e-5)

    print("KERNEL_OK")
</pallas_src>

<mosaic_0001>
module attributes {stable_mosaic.version = 11 : i64} {
  func.func @actor_kernel(%arg0: i32, %arg1: memref<16x8xbf16, #tpu.memory_space<vmem>>, %arg2: memref<8x128xbf16, #tpu.memory_space<vmem>>, %arg3: memref<1x128xf32, #tpu.memory_space<vmem>>, %arg4: memref<128x128xbf16, #tpu.memory_space<vmem>>, %arg5: memref<1x128xf32, #tpu.memory_space<vmem>>, %arg6: memref<128x4xbf16, #tpu.memory_space<vmem>>, %arg7: memref<1x4xf32, #tpu.memory_space<vmem>>, %arg8: memref<16x4xf32, #tpu.memory_space<vmem>>) attributes {dimension_semantics = [#tpu.dimension_semantics<parallel>], iteration_bounds = array<i64: 1>, scalar_prefetch = 0 : i64, scratch_operands = 0 : i64, tpu.core_type = #tpu.core_type<tc>, window_params = [{transform_indices = @transform_0, window_bounds = array<i64: 16, 8>}, {pipeline_mode = #tpu.pipeline_mode<synchronous>, transform_indices = @transform_1, window_bounds = array<i64: 8, 128>}, {pipeline_mode = #tpu.pipeline_mode<synchronous>, transform_indices = @transform_2, window_bounds = array<i64: 1, 128>}, {pipeline_mode = #tpu.pipeline_mode<synchronous>, transform_indices = @transform_3, window_bounds = array<i64: 128, 128>}, {pipeline_mode = #tpu.pipeline_mode<synchronous>, transform_indices = @transform_4, window_bounds = array<i64: 1, 128>}, {pipeline_mode = #tpu.pipeline_mode<synchronous>, transform_indices = @transform_5, window_bounds = array<i64: 128, 4>}, {pipeline_mode = #tpu.pipeline_mode<synchronous>, transform_indices = @transform_6, window_bounds = array<i64: 1, 4>}, {transform_indices = @transform_7, window_bounds = array<i64: 16, 4>}]} {
    %c0 = arith.constant 0 : index
    %c0_0 = arith.constant 0 : index
    %0 = vector.load %arg1[%c0, %c0_0] : memref<16x8xbf16, #tpu.memory_space<vmem>>, vector<16x8xbf16>
    %c0_1 = arith.constant 0 : index
    %c0_2 = arith.constant 0 : index
    %1 = vector.load %arg2[%c0_1, %c0_2] : memref<8x128xbf16, #tpu.memory_space<vmem>>, vector<8x128xbf16>
    %cst = arith.constant dense<0.000000e+00> : vector<16x128xf32>
    %2 = tpu.matmul %0, %1, %cst {dimension_numbers = #tpu.dot_dimension_numbers<[1], [0], [0], [1], [0, 0, 1, 1], [], []>} : vector<16x8xbf16>, vector<8x128xbf16>, vector<16x128xf32> -> vector<16x128xf32>
    %c0_3 = arith.constant 0 : index
    %c0_4 = arith.constant 0 : index
    %3 = vector.load %arg3[%c0_3, %c0_4] : memref<1x128xf32, #tpu.memory_space<vmem>>, vector<1x128xf32>
    %4 = vector.broadcast %3 : vector<1x128xf32> to vector<16x128xf32>
    %5 = arith.addf %2, %4 : vector<16x128xf32>
    %cst_5 = arith.constant 0.000000e+00 : f32
    %6 = vector.broadcast %cst_5 : f32 to vector<16x128xf32>
    %7 = arith.maximumf %5, %6 : vector<16x128xf32>
    %8 = arith.truncf %7 : vector<16x128xf32> to vector<16x128xbf16>
    %c0_6 = arith.constant 0 : index
    %c0_7 = arith.constant 0 : index
    %9 = vector.load %arg4[%c0_6, %c0_7] : memref<128x128xbf16, #tpu.memory_space<vmem>>, vector<128x128xbf16>
    %cst_8 = arith.constant dense<0.000000e+00> : vector<16x128xf32>
    %10 = tpu.matmul %8, %9, %cst_8 {dimension_numbers = #tpu.dot_dimension_numbers<[1], [0], [0], [1], [0, 0, 1, 1], [], []>} : vector<16x128xbf16>, vector<128x128xbf16>, vector<16x128xf32> -> vector<16x128xf32>
    %c0_9 = arith.constant 0 : index
    %c0_10 = arith.constant 0 : index
    %11 = vector.load %arg5[%c0_9, %c0_10] : memref<1x128xf32, #tpu.memory_space<vmem>>, vector<1x128xf32>
    %12 = vector.broadcast %11 : vector<1x128xf32> to vector<16x128xf32>
    %13 = arith.addf %10, %12 : vector<16x128xf32>
    %cst_11 = arith.constant 0.000000e+00 : f32
    %14 = vector.broadcast %cst_11 : f32 to vector<16x128xf32>
    %15 = arith.maximumf %13, %14 : vector<16x128xf32>
    %16 = arith.truncf %15 : vector<16x128xf32> to vector<16x128xbf16>
    %c0_12 = arith.constant 0 : index
    %c0_13 = arith.constant 0 : index
    %17 = vector.load %arg6[%c0_12, %c0_13] : memref<128x4xbf16, #tpu.memory_space<vmem>>, vector<128x4xbf16>
    %cst_14 = arith.constant dense<0.000000e+00> : vector<16x4xf32>
    %18 = tpu.matmul %16, %17, %cst_14 {dimension_numbers = #tpu.dot_dimension_numbers<[1], [0], [0], [1], [0, 0, 1, 1], [], []>} : vector<16x128xbf16>, vector<128x4xbf16>, vector<16x4xf32> -> vector<16x4xf32>
    %c0_15 = arith.constant 0 : index
    %c0_16 = arith.constant 0 : index
    %19 = vector.load %arg7[%c0_15, %c0_16] : memref<1x4xf32, #tpu.memory_space<vmem>>, vector<1x4xf32>
    %20 = vector.broadcast %19 : vector<1x4xf32> to vector<16x4xf32>
    %21 = arith.addf %18, %20 : vector<16x4xf32>
    %22 = math.tanh %21 : vector<16x4xf32>
    %cst_17 = arith.constant 2.000000e+00 : f32
    %23 = vector.broadcast %cst_17 : f32 to vector<16x4xf32>
    %24 = arith.mulf %22, %23 : vector<16x4xf32>
    %c0_18 = arith.constant 0 : index
    %c0_19 = arith.constant 0 : index
    %25 = vector.load %arg8[%c0_18, %c0_19] : memref<16x4xf32, #tpu.memory_space<vmem>>, vector<16x4xf32>
    tpu.vector_store %arg8[%c0_18, %c0_19], %24 {strides = array<i32>} : memref<16x4xf32, #tpu.memory_space<vmem>>, vector<16x4xf32>,
    return
  }
  func.func @transform_0(%arg0: i32) -> (i32, i32) {
    %c0_i32 = arith.constant 0 : i32
    %c0_i32_0 = arith.constant 0 : i32
    return %arg0, %c0_i32 : i32, i32
  }
  func.func @transform_1(%arg0: i32) -> (i32, i32) {
    %c0_i32 = arith.constant 0 : i32
    %c0_i32_0 = arith.constant 0 : i32
    %c0_i32_1 = arith.constant 0 : i32
    return %c0_i32, %c0_i32_0 : i32, i32
  }
  func.func @transform_2(%arg0: i32) -> (i32, i32) {
    %c0_i32 = arith.constant 0 : i32
    %c0_i32_0 = arith.constant 0 : i32
    %c0_i32_1 = arith.constant 0 : i32
    return %c0_i32, %c0_i32_0 : i32, i32
  }
  func.func @transform_3(%arg0: i32) -> (i32, i32) {
    %c0_i32 = arith.constant 0 : i32
    %c0_i32_0 = arith.constant 0 : i32
    %c0_i32_1 = arith.constant 0 : i32
    return %c0_i32, %c0_i32_0 : i32, i32
  }
  func.func @transform_4(%arg0: i32) -> (i32, i32) {
    %c0_i32 = arith.constant 0 : i32
    %c0_i32_0 = arith.constant 0 : i32
    %c0_i32_1 = arith.constant 0 : i32
    return %c0_i32, %c0_i32_0 : i32, i32
  }
  func.func @transform_5(%arg0: i32) -> (i32, i32) {
    %c0_i32 = arith.constant 0 : i32
    %c0_i32_0 = arith.constant 0 : i32
    %c0_i32_1 = arith.constant 0 : i32
    return %c0_i32, %c0_i32_0 : i32, i32
  }
  func.func @transform_6(%arg0: i32) -> (i32, i32) {
    %c0_i32 = arith.constant 0 : i32
    %c0_i32_0 = arith.constant 0 : i32
    %c0_i32_1 = arith.constant 0 : i32
    return %c0_i32, %c0_i32_0 : i32, i32
  }
  func.func @transform_7(%arg0: i32) -> (i32, i32) {
    %c0_i32 = arith.constant 0 : i32
    %c0_i32_0 = arith.constant 0 : i32
    return %arg0, %c0_i32 : i32, i32
  }
}

module attributes {stable_mosaic.version = 11 : i64} {
  func.func @actor_kernel(%arg0: i32, %arg1: memref<16x8xbf16, #tpu.memory_space<vmem>>, %arg2: memref<8x128xbf16, #tpu.memory_space<vmem>>, %arg3: memref<1x128xf32, #tpu.memory_space<vmem>>, %arg4: memref<128x128xbf16, #tpu.memory_space<vmem>>, %arg5: memref<1x128xf32, #tpu.memory_space<vmem>>, %arg6: memref<128x4xbf16, #tpu.memory_space<vmem>>, %arg7: memref<1x4xf32, #tpu.memory_space<vmem>>, %arg8: memref<16x4xf32, #tpu.memory_space<vmem>>) attributes {dimension_semantics = [#tpu.dimension_semantics<parallel>], iteration_bounds = array<i64: 1>, scalar_prefetch = 0 : i64, scratch_operands = 0 : i64, tpu.core_type = #tpu.core_type<tc>, window_params = [{transform_indices = @transform_0, window_bounds = array<i64: 16, 8>}, {pipeline_mode = #tpu.pipeline_mode<synchronous>, transform_indices = @transform_1, window_bounds = array<i64: 8, 128>}, {pipeline_mode = #tpu.pipeline_mode<synchronous>, transform_indices = @transform_2, window_bounds = array<i64: 1, 128>}, {pipeline_mode = #tpu.pipeline_mode<synchronous>, transform_indices = @transform_3, window_bounds = array<i64: 128, 128>}, {pipeline_mode = #tpu.pipeline_mode<synchronous>, transform_indices = @transform_4, window_bounds = array<i64: 1, 128>}, {pipeline_mode = #tpu.pipeline_mode<synchronous>, transform_indices = @transform_5, window_bounds = array<i64: 128, 4>}, {pipeline_mode = #tpu.pipeline_mode<synchronous>, transform_indices = @transform_6, window_bounds = array<i64: 1, 4>}, {transform_indices = @transform_7, window_bounds = array<i64: 16, 4>}]} {
    %c0 = arith.constant 0 : index
    %c0_0 = arith.constant 0 : index
    %0 = vector.load %arg1[%c0, %c0_0] : memref<16x8xbf16, #tpu.memory_space<vmem>>, vector<16x8xbf16>
    %c0_1 = arith.constant 0 : index
    %c0_2 = arith.constant 0 : index
    %1 = vector.load %arg2[%c0_1, %c0_2] : memref<8x128xbf16, #tpu.memory_space<vmem>>, vector<8x128xbf16>
    %cst = arith.constant dense<0.000000e+00> : vector<16x128xf32>
    %2 = tpu.matmul %0, %1, %cst {dimension_numbers = #tpu.dot_dimension_numbers<[1], [0], [0], [1], [0, 0, 1, 1], [], []>} : vector<16x8xbf16>, vector<8x128xbf16>, vector<16x128xf32> -> vector<16x128xf32>
    %c0_3 = arith.constant 0 : index
    %c0_4 = arith.constant 0 : index
    %3 = vector.load %arg3[%c0_3, %c0_4] : memref<1x128xf32, #tpu.memory_space<vmem>>, vector<1x128xf32>
    %4 = vector.broadcast %3 : vector<1x128xf32> to vector<16x128xf32>
    %5 = arith.addf %2, %4 : vector<16x128xf32>
    %cst_5 = arith.constant 0.000000e+00 : f32
    %6 = vector.broadcast %cst_5 : f32 to vector<16x128xf32>
    %7 = arith.maximumf %5, %6 : vector<16x128xf32>
    %8 = arith.truncf %7 : vector<16x128xf32> to vector<16x128xbf16>
    %c0_6 = arith.constant 0 : index
    %c0_7 = arith.constant 0 : index
    %9 = vector.load %arg4[%c0_6, %c0_7] : memref<128x128xbf16, #tpu.memory_space<vmem>>, vector<128x128xbf16>
    %cst_8 = arith.constant dense<0.000000e+00> : vector<16x128xf32>
    %10 = tpu.matmul %8, %9, %cst_8 {dimension_numbers = #tpu.dot_dimension_numbers<[1], [0], [0], [1], [0, 0, 1, 1], [], []>} : vector<16x128xbf16>, vector<128x128xbf16>, vector<16x128xf32> -> vector<16x128xf32>
    %c0_9 = arith.constant 0 : index
    %c0_10 = arith.constant 0 : index
    %11 = vector.load %arg5[%c0_9, %c0_10] : memref<1x128xf32, #tpu.memory_space<vmem>>, vector<1x128xf32>
    %12 = vector.broadcast %11 : vector<1x128xf32> to vector<16x128xf32>
    %13 = arith.addf %10, %12 : vector<16x128xf32>
    %cst_11 = arith.constant 0.000000e+00 : f32
    %14 = vector.broadcast %cst_11 : f32 to vector<16x128xf32>
    %15 = arith.maximumf %13, %14 : vector<16x128xf32>
    %16 = arith.truncf %15 : vector<16x128xf32> to vector<16x128xbf16>
    %c0_12 = arith.constant 0 : index
    %c0_13 = arith.constant 0 : index
    %17 = vector.load %arg6[%c0_12, %c0_13] : memref<128x4xbf16, #tpu.memory_space<vmem>>, vector<128x4xbf16>
    %cst_14 = arith.constant dense<0.000000e+00> : vector<16x4xf32>
    %18 = tpu.matmul %16, %17, %cst_14 {dimension_numbers = #tpu.dot_dimension_numbers<[1], [0], [0], [1], [0, 0, 1, 1], [], []>} : vector<16x128xbf16>, vector<128x4xbf16>, vector<16x4xf32> -> vector<16x4xf32>
    %c0_15 = arith.constant 0 : index
    %c0_16 = arith.constant 0 : index
    %19 = vector.load %arg7[%c0_15, %c0_16] : memref<1x4xf32, #tpu.memory_space<vmem>>, vector<1x4xf32>
    %20 = vector.broadcast %19 : vector<1x4xf32> to vector<16x4xf32>
    %21 = arith.addf %18, %20 : vector<16x4xf32>
    %22 = math.tanh %21 : vector<16x4xf32>
    %cst_17 = arith.constant 2.000000e+00 : f32
    %23 = vector.broadcast %cst_17 : f32 to vector<16x4xf32>
    %24 = arith.mulf %22, %23 : vector<16x4xf32>
    %c0_18 = arith.constant 0 : index
    %c0_19 = arith.constant 0 : index
    %25 = vector.load %arg8[%c0_18, %c0_19] : memref<16x4xf32, #tpu.memory_space<vmem>>, vector<16x4xf32>
    tpu.vector_store %arg8[%c0_18, %c0_19], %24 {strides = array<i32>} : memref<16x4xf32, #tpu.memory_space<vmem>>, vector<16x4xf32>,
    return
  }
  func.func @transform_0(%arg0: i32) -> (i32, i32) {
    %c0_i32 = arith.constant 0 : i32
    %c0_i32_0 = arith.constant 0 : i32
    return %arg0, %c0_i32 : i32, i32
  }
  func.func @transform_1(%arg0: i32) -> (i32, i32) {
    %c0_i32 = arith.constant 0 : i32
    %c0_i32_0 = arith.constant 0 : i32
    %c0_i32_1 = arith.constant 0 : i32
    return %c0_i32, %c0_i32_0 : i32, i32
  }
  func.func @transform_2(%arg0: i32) -> (i32, i32) {
    %c0_i32 = arith.constant 0 : i32
    %c0_i32_0 = arith.constant 0 : i32
    %c0_i32_1 = arith.constant 0 : i32
    return %c0_i32, %c0_i32_0 : i32, i32
  }
  func.func @transform_3(%arg0: i32) -> (i32, i32) {
    %c0_i32 = arith.constant 0 : i32
    %c0_i32_0 = arith.constant 0 : i32
    %c0_i32_1 = arith.constant 0 : i32
    return %c0_i32, %c0_i32_0 : i32, i32
  }
  func.func @transform_4(%arg0: i32) -> (i32, i32) {
    %c0_i32 = arith.constant 0 : i32
    %c0_i32_0 = arith.constant 0 : i32
    %c0_i32_1 = arith.constant 0 : i32
    return %c0_i32, %c0_i32_0 : i32, i32
  }
  func.func @transform_5(%arg0: i32) -> (i32, i32) {
    %c0_i32 = arith.constant 0 : i32
    %c0_i32_0 = arith.constant 0 : i32
    %c0_i32_1 = arith.constant 0 : i32
    return %c0_i32, %c0_i32_0 : i32, i32
  }
  func.func @transform_6(%arg0: i32) -> (i32, i32) {
    %c0_i32 = arith.constant 0 : i32
    %c0_i32_0 = arith.constant 0 : i32
    %c0_i32_1 = arith.constant 0 : i32
    return %c0_i32, %c0_i32_0 : i32, i32
  }
  func.func @transform_7(%arg0: i32) -> (i32, i32) {
    %c0_i32 = arith.constant 0 : i32
    %c0_i32_0 = arith.constant 0 : i32
    return %arg0, %c0_i32 : i32, i32
  }
}

</mosaic_0001>

<bundles_post_ra>
// kernel: tpu_custom_call.1
= control target key start
LH: loop header
LB: loop body
LE: loop exit
PB: predicated region body
PF: predicated region fallthrough
CT: control target
= control target key end

     0   :  { %vm46_vm0 = vcmask 1043456   ;;  %v442_v0 = vmov 0.0   ;;  %vm443_vm1 = vmmov 0   ;;  %vm42_vm2 = vcmask 64512   ;;  %s573_s1 = inlined_call_operand.vmem [shape: bf16[8,128], index: 1, kind: input, shape index: {}]   ;;  %s574_s0 = inlined_call_operand.vmem [shape: bf16[16,8], index: 0, kind: input, shape index: {}]   ;;  %s575_s3 = inlined_call_operand.vmem [shape: bf16[128,128], index: 3, kind: input, shape index: {}]   ;;  %s576_s5 = inlined_call_operand.vmem [shape: bf16[128,4], index: 5, kind: input, shape index: {}]   ;;  %s577_s2 = inlined_call_operand.vmem [shape: f32[1,128], index: 2, kind: input, shape index: {}]   ;;  %s578_s4 = inlined_call_operand.vmem [shape: f32[1,128], index: 4, kind: input, shape index: {}]   ;;  %s579_s6 = inlined_call_operand.vmem [shape: f32[1,4], index: 6, kind: input, shape index: {}]   ;;  %s580_s7 = inlined_call_operand.vmem [shape: f32[16,4], index: 7, kind: output, shape index: {}]  }
   0x1   :  { %373 = vmatprep.subr.bf16.mxu0 %v442_v0  ;;  %v29_v1 = vld [vmem:[%s573_s1] sm:$0xf]  ;;  %375 = vmatprep.mubr.msk.bf16.mxu0 %vm443_vm1, %v442_v0  ;;  %v422_v4 = vld [vmem:[%s575_s3 + $0x38] sm:$0xff]   ;;  %v423_v5 = vld [vmem:[%s575_s3 + $0x30] sm:$0xff]   ;;  %vm325_vm3 = vcmask 31744  }
   0x2   :  { %v48_v2 = vsel %vm46_vm0, %v29_v1, 0  ;;  %v421_v3 = vld [vmem:[%s574_s0] sm:$0xff]   ;;  %379 = vmatprep.subr.bf16.mxu1 %v442_v0  ;;  %395 = vmatprep.mubr.msk.bf16.mxu1 %vm443_vm1, %v442_v0  ;;  %v424_v6 = vld [vmem:[%s575_s3 + $0x28] sm:$0xff]   ;;  %v426_v8 = vld [vmem:[%s575_s3 + $0x18] sm:$0xff]  }
   0x3   :  { %374 = vmatpush3.bf16.msra.mxu0 %v48_v2  ;;  %380 = vmatpush3.bf16.msra.mxu1 %v422_v4  ;;  %v425_v7 = vld [vmem:[%s575_s3 + $0x20] sm:$0xff]   ;;  %v427_v9 = vld [vmem:[%s575_s3 + $0x10] sm:$0xff]   ;;  %v428_v10 = vld [vmem:[%s575_s3 + $0x8] sm:$0xff]  }
   0x4   :  { %399 = vmatprep.subr.bf16.mxu0 %v442_v0  ;;  %381 = vmatprep.subr.bf16.mxu1 %v442_v0  ;;  %v429_v11 = vld [vmem:[%s575_s3] sm:$0xff]   ;;  %v430_v12 = vld [vmem:[%s576_s5 + $0x38] sm:$0xff]   ;;  %v431_v13 = vld [vmem:[%s576_s5 + $0x30] sm:$0xff]  }
   0x5   :  { %v432_v14 = vld [vmem:[%s576_s5 + $0x28] sm:$0xff]   ;;  %v433_v15 = vld [vmem:[%s576_s5 + $0x20] sm:$0xff]   ;;  %v434_v16 = vld [vmem:[%s576_s5 + $0x18] sm:$0xff]  }
   0x6   :  { %376 = vmatmul.mubr.msk.bf16.vlgmr.msra.gmra.mxu0 %vm42_vm2, %v421_v3  ;;  %v332_v17 = vld [vmem:[%s577_s2] ss:$0 sm:$0xff]  ;;  %v435_v27 = vld [vmem:[%s576_s5 + $0x10] sm:$0xff]   ;;  %v436_v28 = vld [vmem:[%s576_s5 + $0x8] sm:$0xff]  }
   0x7   :  { %415 = vmatprep.mubr.msk.bf16.mxu0 %vm443_vm1, %v442_v0  ;;  %382 = vmatpush3.bf16.msra.mxu1 %v423_v5  ;;  %v437_v29 = vld [vmem:[%s576_s5] sm:$0xff]  }
   0x8   :  { %383 = vmatprep.subr.bf16.mxu1 %v442_v0  ;;  %400 = vmatpush3.bf16.msra.mxu0 %v430_v12  ;;  %v335_v30 = vld [vmem:[%s578_s4] ss:$0 sm:$0xff] }
   0x9   :  { %401 = vmatprep.subr.bf16.mxu0 %v442_v0  ;;  %v344_v40 = vld [vmem:[%s579_s6] ss:$0 sm:$0xff] }
   0xb   :  { %384 = vmatpush3.bf16.msra.mxu1 %v424_v6 }
   0xc   :  { %385 = vmatprep.subr.bf16.mxu1 %v442_v0  ;;  %402 = vmatpush3.bf16.msra.mxu0 %v431_v13 }
   0xd   :  { %403 = vmatprep.subr.bf16.mxu0 %v442_v0 }
   0xf   :  { %386 = vmatpush3.bf16.msra.mxu1 %v425_v7 }
  0x10   :  { %387 = vmatprep.subr.bf16.mxu1 %v442_v0  ;;  %404 = vmatpush3.bf16.msra.mxu0 %v432_v14 }
  0x11   :  { %405 = vmatprep.subr.bf16.mxu0 %v442_v0 }
  0x13   :  { %388 = vmatpush3.bf16.msra.mxu1 %v426_v8 }
  0x14   :  { %389 = vmatprep.subr.bf16.mxu1 %v442_v0  ;;  %406 = vmatpush3.bf16.msra.mxu0 %v433_v15 }
  0x15   :  { %407 = vmatprep.subr.bf16.mxu0 %v442_v0 }
  0x17   :  { %390 = vmatpush3.bf16.msra.mxu1 %v427_v9 }
  0x18   :  { %391 = vmatprep.subr.bf16.mxu1 %v442_v0  ;;  %408 = vmatpush3.bf16.msra.mxu0 %v434_v16 }
  0x19   :  { %409 = vmatprep.subr.bf16.mxu0 %v442_v0 }
  0x1b   :  { %392 = vmatpush3.bf16.msra.mxu1 %v428_v10 }
  0x1c   :  { %393 = vmatprep.subr.bf16.mxu1 %v442_v0  ;;  %410 = vmatpush3.bf16.msra.mxu0 %v435_v27 }
  0x1d   :  { %411 = vmatprep.subr.bf16.mxu0 %v442_v0 }
  0x1f   :  { %394 = vmatpush3.bf16.msra.mxu1 %v429_v11 }
  0x20   :  { %412 = vmatpush3.bf16.msra.mxu0 %v436_v28 }
  0x21   :  { %413 = vmatprep.subr.bf16.mxu0 %v442_v0 }
  0x24   :  { %414 = vmatpush3.bf16.msra.mxu0 %v437_v29 }
  0xc6   :  { %v84_v18 = vpop.f32.mrf.mxu0 }
  0xc7   :  { %v85_v20 = vadd.f32 %v332_v17, %v84_v18 }
  0xc8   :  { %v377_v19 = vpop.f32.mrf.mxu0 }
  0xc9   :  { %v91_v24 = vmax.f32 %v85_v20, 0.0 }
  0xca   :  { %v87_v21 = vpop.f32.mrf.mxu0 }
  0xcb   :  { %v88_v22 = vadd.f32 %v332_v17, %v87_v21 }
  0xcc   :  { %v378_v23 = vpop.f32.mrf.mxu0 }
  0xcd   :  { %v92_v25 = vmax.f32 %v88_v22, 0.0 }
  0xcf   :  { %v93_v26 = vpack.c.bf16 %v92_v25, %v91_v24 }
  0xd1   :  { %396 = vmatmul.mubr.bf16.vlgmr.msra.gmra.mxu1 %v93_v26 }
 0x191   :  { %v199_v31 = vpop.f32.mrf.mxu1 }
 0x192   :  { %v200_v33 = vadd.f32 %v335_v30, %v199_v31 }
 0x193   :  { %v397_v32 = vpop.f32.mrf.mxu1 }
 0x194   :  { %v206_v37 = vmax.f32 %v200_v33, 0.0 }
 0x195   :  { %v202_v34 = vpop.f32.mrf.mxu1 }
 0x196   :  { %v203_v35 = vadd.f32 %v335_v30, %v202_v34 }
 0x197   :  { %v398_v36 = vpop.f32.mrf.mxu1 }
 0x198   :  { %v207_v38 = vmax.f32 %v203_v35, 0.0 }
 0x19a   :  { %v208_v39 = vpack.c.bf16 %v207_v38, %v206_v37 }
 0x19c   :  { %416 = vmatmul.mubr.bf16.vlgmr.msra.gmra.mxu0 %v208_v39 }
 0x25c   :  { %v314_v41 = vpop.f32.mrf.mxu0 }
 0x25d   :  { %v315_v42 = vadd.f32 %v344_v40, %v314_v41 }
 0x25e   :  { %v417_v43 = vpop.f32.mrf.mxu0 }
 0x25f   :  { %438 = vtanh.f32 %v315_v42 }
 0x260   :  { %v317_v44 = vpop.f32.mrf.mxu0 }
 0x261   :  { %v318_v45 = vadd.f32 %v344_v40, %v317_v44 }
 0x262   :  { %v418_v46 = vpop.f32.mrf.mxu0 }
 0x263   :  { %440 = vtanh.f32 %v318_v45 }
 0x26c   :  { %v439_v47 = vpop.eup %438 }
 0x26d   :  { %v323_v48 = vmul.f32 2.0, %v439_v47 }
 0x26f   :  { %326 = vst.msk [vmem:[%s580_s7] sm:$0xff] %vm325_vm3, %v323_v48 }
 0x270   :  { %v441_v49 = vpop.eup %440 }
 0x271   :  { %v324_v50 = vmul.f32 2.0, %v441_v49 }
 0x273   :  { %327 = vst.msk [vmem:[%s580_s7 + $0x8] sm:$0xff] %vm325_vm3, %v324_v50 }

// kernel: tpu_custom_call.1
= control target key start
LH: loop header
LB: loop body
LE: loop exit
PB: predicated region body
PF: predicated region fallthrough
CT: control target
= control target key end

     0   :  { %vm46_vm0 = vcmask 1043456   ;;  %v442_v0 = vmov 0.0   ;;  %vm443_vm1 = vmmov 0   ;;  %vm42_vm2 = vcmask 64512   ;;  %s573_s1 = inlined_call_operand.vmem [shape: bf16[8,128], index: 1, kind: input, shape index: {}]   ;;  %s574_s0 = inlined_call_operand.vmem [shape: bf16[16,8], index: 0, kind: input, shape index: {}]   ;;  %s575_s3 = inlined_call_operand.vmem [shape: bf16[128,128], index: 3, kind: input, shape index: {}]   ;;  %s576_s5 = inlined_call_operand.vmem [shape: bf16[128,4], index: 5, kind: input, shape index: {}]   ;;  %s577_s2 = inlined_call_operand.vmem [shape: f32[1,128], index: 2, kind: input, shape index: {}]   ;;  %s578_s4 = inlined_call_operand.vmem [shape: f32[1,128], index: 4, kind: input, shape index: {}]   ;;  %s579_s6 = inlined_call_operand.vmem [shape: f32[1,4], index: 6, kind: input, shape index: {}]   ;;  %s580_s7 = inlined_call_operand.vmem [shape: f32[16,4], index: 7, kind: output, shape index: {}]  }
   0x1   :  { %373 = vmatprep.subr.bf16.mxu0 %v442_v0  ;;  %v29_v1 = vld [vmem:[%s573_s1] sm:$0xf]  ;;  %375 = vmatprep.mubr.msk.bf16.mxu0 %vm443_vm1, %v442_v0  ;;  %v422_v4 = vld [vmem:[%s575_s3 + $0x38] sm:$0xff]   ;;  %v423_v5 = vld [vmem:[%s575_s3 + $0x30] sm:$0xff]   ;;  %vm325_vm3 = vcmask 31744  }
   0x2   :  { %v48_v2 = vsel %vm46_vm0, %v29_v1, 0  ;;  %v421_v3 = vld [vmem:[%s574_s0] sm:$0xff]   ;;  %379 = vmatprep.subr.bf16.mxu1 %v442_v0  ;;  %395 = vmatprep.mubr.msk.bf16.mxu1 %vm443_vm1, %v442_v0  ;;  %v424_v6 = vld [vmem:[%s575_s3 + $0x28] sm:$0xff]   ;;  %v426_v8 = vld [vmem:[%s575_s3 + $0x18] sm:$0xff]  }
   0x3   :  { %374 = vmatpush3.bf16.msra.mxu0 %v48_v2  ;;  %380 = vmatpush3.bf16.msra.mxu1 %v422_v4  ;;  %v425_v7 = vld [vmem:[%s575_s3 + $0x20] sm:$0xff]   ;;  %v427_v9 = vld [vmem:[%s575_s3 + $0x10] sm:$0xff]   ;;  %v428_v10 = vld [vmem:[%s575_s3 + $0x8] sm:$0xff]  }
   0x4   :  { %399 = vmatprep.subr.bf16.mxu0 %v442_v0  ;;  %381 = vmatprep.subr.bf16.mxu1 %v442_v0  ;;  %v429_v11 = vld [vmem:[%s575_s3] sm:$0xff]   ;;  %v430_v12 = vld [vmem:[%s576_s5 + $0x38] sm:$0xff]   ;;  %v431_v13 = vld [vmem:[%s576_s5 + $0x30] sm:$0xff]  }
   0x5   :  { %v432_v14 = vld [vmem:[%s576_s5 + $0x28] sm:$0xff]   ;;  %v433_v15 = vld [vmem:[%s576_s5 + $0x20] sm:$0xff]   ;;  %v434_v16 = vld [vmem:[%s576_s5 + $0x18] sm:$0xff]  }
   0x6   :  { %376 = vmatmul.mubr.msk.bf16.vlgmr.msra.gmra.mxu0 %vm42_vm2, %v421_v3  ;;  %v332_v17 = vld [vmem:[%s577_s2] ss:$0 sm:$0xff]  ;;  %v435_v27 = vld [vmem:[%s576_s5 + $0x10] sm:$0xff]   ;;  %v436_v28 = vld [vmem:[%s576_s5 + $0x8] sm:$0xff]  }
   0x7   :  { %415 = vmatprep.mubr.msk.bf16.mxu0 %vm443_vm1, %v442_v0  ;;  %382 = vmatpush3.bf16.msra.mxu1 %v423_v5  ;;  %v437_v29 = vld [vmem:[%s576_s5] sm:$0xff]  }
   0x8   :  { %383 = vmatprep.subr.bf16.mxu1 %v442_v0  ;;  %400 = vmatpush3.bf16.msra.mxu0 %v430_v12  ;;  %v335_v30 = vld [vmem:[%s578_s4] ss:$0 sm:$0xff] }
   0x9   :  { %401 = vmatprep.subr.bf16.mxu0 %v442_v0  ;;  %v344_v40 = vld [vmem:[%s579_s6] ss:$0 sm:$0xff] }
   0xb   :  { %384 = vmatpush3.bf16.msra.mxu1 %v424_v6 }
   0xc   :  { %385 = vmatprep.subr.bf16.mxu1 %v442_v0  ;;  %402 = vmatpush3.bf16.msra.mxu0 %v431_v13 }
   0xd   :  { %403 = vmatprep.subr.bf16.mxu0 %v442_v0 }
   0xf   :  { %386 = vmatpush3.bf16.msra.mxu1 %v425_v7 }
  0x10   :  { %387 = vmatprep.subr.bf16.mxu1 %v442_v0  ;;  %404 = vmatpush3.bf16.msra.mxu0 %v432_v14 }
  0x11   :  { %405 = vmatprep.subr.bf16.mxu0 %v442_v0 }
  0x13   :  { %388 = vmatpush3.bf16.msra.mxu1 %v426_v8 }
  0x14   :  { %389 = vmatprep.subr.bf16.mxu1 %v442_v0  ;;  %406 = vmatpush3.bf16.msra.mxu0 %v433_v15 }
  0x15   :  { %407 = vmatprep.subr.bf16.mxu0 %v442_v0 }
  0x17   :  { %390 = vmatpush3.bf16.msra.mxu1 %v427_v9 }
  0x18   :  { %391 = vmatprep.subr.bf16.mxu1 %v442_v0  ;;  %408 = vmatpush3.bf16.msra.mxu0 %v434_v16 }
  0x19   :  { %409 = vmatprep.subr.bf16.mxu0 %v442_v0 }
  0x1b   :  { %392 = vmatpush3.bf16.msra.mxu1 %v428_v10 }
  0x1c   :  { %393 = vmatprep.subr.bf16.mxu1 %v442_v0  ;;  %410 = vmatpush3.bf16.msra.mxu0 %v435_v27 }
  0x1d   :  { %411 = vmatprep.subr.bf16.mxu0 %v442_v0 }
  0x1f   :  { %394 = vmatpush3.bf16.msra.mxu1 %v429_v11 }
  0x20   :  { %412 = vmatpush3.bf16.msra.mxu0 %v436_v28 }
  0x21   :  { %413 = vmatprep.subr.bf16.mxu0 %v442_v0 }
  0x24   :  { %414 = vmatpush3.bf16.msra.mxu0 %v437_v29 }
  0xc6   :  { %v84_v18 = vpop.f32.mrf.mxu0 }
  0xc7   :  { %v85_v20 = vadd.f32 %v332_v17, %v84_v18 }
  0xc8   :  { %v377_v19 = vpop.f32.mrf.mxu0 }
  0xc9   :  { %v91_v24 = vmax.f32 %v85_v20, 0.0 }
  0xca   :  { %v87_v21 = vpop.f32.mrf.mxu0 }
  0xcb   :  { %v88_v22 = vadd.f32 %v332_v17, %v87_v21 }
  0xcc   :  { %v378_v23 = vpop.f32.mrf.mxu0 }
  0xcd   :  { %v92_v25 = vmax.f32 %v88_v22, 0.0 }
  0xcf   :  { %v93_v26 = vpack.c.bf16 %v92_v25, %v91_v24 }
  0xd1   :  { %396 = vmatmul.mubr.bf16.vlgmr.msra.gmra.mxu1 %v93_v26 }
 0x191   :  { %v199_v31 = vpop.f32.mrf.mxu1 }
 0x192   :  { %v200_v33 = vadd.f32 %v335_v30, %v199_v31 }
 0x193   :  { %v397_v32 = vpop.f32.mrf.mxu1 }
 0x194   :  { %v206_v37 = vmax.f32 %v200_v33, 0.0 }
 0x195   :  { %v202_v34 = vpop.f32.mrf.mxu1 }
 0x196   :  { %v203_v35 = vadd.f32 %v335_v30, %v202_v34 }
 0x197   :  { %v398_v36 = vpop.f32.mrf.mxu1 }
 0x198   :  { %v207_v38 = vmax.f32 %v203_v35, 0.0 }
 0x19a   :  { %v208_v39 = vpack.c.bf16 %v207_v38, %v206_v37 }
 0x19c   :  { %416 = vmatmul.mubr.bf16.vlgmr.msra.gmra.mxu0 %v208_v39 }
 0x25c   :  { %v314_v41 = vpop.f32.mrf.mxu0 }
 0x25d   :  { %v315_v42 = vadd.f32 %v344_v40, %v314_v41 }
 0x25e   :  { %v417_v43 = vpop.f32.mrf.mxu0 }
 0x25f   :  { %438 = vtanh.f32 %v315_v42 }
 0x260   :  { %v317_v44 = vpop.f32.mrf.mxu0 }
 0x261   :  { %v318_v45 = vadd.f32 %v344_v40, %v317_v44 }
 0x262   :  { %v418_v46 = vpop.f32.mrf.mxu0 }
 0x263   :  { %440 = vtanh.f32 %v318_v45 }
 0x26c   :  { %v439_v47 = vpop.eup %438 }
 0x26d   :  { %v323_v48 = vmul.f32 2.0, %v439_v47 }
 0x26f   :  { %326 = vst.msk [vmem:[%s580_s7] sm:$0xff] %vm325_vm3, %v323_v48 }
 0x270   :  { %v441_v49 = vpop.eup %440 }
 0x271   :  { %v324_v50 = vmul.f32 2.0, %v441_v49 }
 0x273   :  { %327 = vst.msk [vmem:[%s580_s7 + $0x8] sm:$0xff] %vm325_vm3, %v324_v50 }

</bundles_post_ra>
